<compile_context>
chip_gen: v7x
topology: tpu7x:2x2x1
jax: 0.10.0
libtpu: 0.0.40
codegen_flags: <defaults>
</compile_context>

<pallas_src>
import jax
import jax.numpy as jnp
from jax.experimental import pallas as pl
from jax.experimental.pallas import tpu as pltpu


def _round_up(n, m):
    return ((n + m - 1) // m) * m


def _qvalue_head_kernel(x_ref, w_ref, b_ref, o_ref):
    # x_ref: [TM, E*P]  w_ref: [E*P, A*P]  b_ref: [1, A*P]  o_ref: [TM, A*P]
    y = jnp.dot(x_ref[...], w_ref[...], preferred_element_type=jnp.float32)
    o_ref[...] = (y + b_ref[...]).astype(o_ref.dtype)


def pack_qvalue_params(w, b, pack):
    """One-time (init-time) packing of Linear params into a lane-dense form.

    w: [E, A]  (transpose of torch Linear.weight), b: [A]
    Returns W' = blockdiag(w x pack) [E*pack, A*pack], b' = tile(b, pack) [1, A*pack].
    """
    eye = jnp.eye(pack, dtype=w.dtype)
    w_packed = jnp.kron(eye, w)                      # [E*pack, A*pack]
    b_packed = jnp.tile(b, pack).reshape(1, -1)      # [1, A*pack]
    return w_packed, b_packed


def qvalue_head(x, w_packed, b_packed, *, pack, num_actions,
                max_packed_rows=2048, min_grid_steps=2):
    """y = x @ W + b via a lane-packed, batch-tiled Pallas kernel.

    x:        [B, E] float32
    w_packed: [E*pack, A*pack] float32 (block-diagonal, from pack_qvalue_params)
    b_packed: [1, A*pack] float32
    returns:  [B, num_actions] float32
    """
    B, E = x.shape
    EP, AP = w_packed.shape
    assert EP == E * pack and AP == num_actions * pack
    itemsize = jnp.dtype(x.dtype).itemsize

    # Pad batch only up to the pack factor (tiny; rows >= B are sliced off).
    B_pk = _round_up(B, pack)
    if B_pk != B:
        x = jnp.pad(x, ((0, B_pk - B), (0, 0)))
    R = B_pk // pack
    x_packed = x.reshape(R, EP)   # free: row-major contiguous

    # Packed-row tile: big enough to amortize per-step overhead, small enough
    # to keep >= min_grid_steps grid steps (v7x megacore + pipeline overlap).
    if R <= 8:
        tm = R  # block equals full array dim (small-batch path)
    else:
        tm = min(max_packed_rows,
                 _round_up((R + min_grid_steps - 1) // min_grid_steps, 8))
        tm = max(tm, 8)
    grid = ((R + tm - 1) // tm,)

    # VMEM: double-buffered x & out tiles + resident W'/b', +25% margin.
    need = (2 * tm * EP + EP * AP + AP + 2 * tm * AP) * itemsize
    vmem_limit = int(min(100 * 1024 * 1024, max(need * 5 // 4, 8 * 1024 * 1024)))

    cost = pl.CostEstimate(
        flops=2 * B * E * num_actions,
        transcendentals=0,
        bytes_accessed=(B_pk * E + EP * AP + AP + B_pk * num_actions) * itemsize,
    )

    out = pl.pallas_call(
        _qvalue_head_kernel,
        out_shape=jax.ShapeDtypeStruct((R, AP), jnp.float32),
        grid_spec=pl.GridSpec(
            grid=grid,
            in_specs=[
                pl.BlockSpec((tm, EP), lambda i: (i, 0)),   # packed x: tiled/pipelined
                pl.BlockSpec((EP, AP), lambda i: (0, 0)),   # W': resident in VMEM
                pl.BlockSpec((1, AP), lambda i: (0, 0)),    # b': resident in VMEM
            ],
            out_specs=pl.BlockSpec((tm, AP), lambda i: (i, 0)),
        ),
        compiler_params=pltpu.CompilerParams(
            dimension_semantics=("parallel",),  # megacore split on v7x; no-op on v5e/v6e
            vmem_limit_bytes=vmem_limit,
        ),
        cost_estimate=cost,
    )(x_packed, w_packed, b_packed)

    y = out.reshape(B_pk, num_actions)  # free unpack of the lane-packed output
    return y[:B] if B_pk != B else y


if __name__ == "__main__":
    # Small shapes consistent with the module: embed_dim=32, num_actions=8,
    # batch of 16 agent hidden states.
    embed_dim = 32
    num_actions = 8
    batch = 16

    key = jax.random.PRNGKey(0)
    kx, kw, kb = jax.random.split(key, 3)

    x = jax.random.normal(kx, (batch, embed_dim), dtype=jnp.float32)
    # Deterministic parameter init (torch Linear-style uniform bound).
    bound = 1.0 / (embed_dim ** 0.5)
    w = jax.random.uniform(kw, (embed_dim, num_actions), jnp.float32, -bound, bound)
    b = jax.random.uniform(kb, (num_actions,), jnp.float32, -bound, bound)

    # Pack the (static) weights once, outside the hot path.
    pack = max(1, 128 // num_actions) if num_actions < 128 else 1
    w_packed, b_packed = pack_qvalue_params(w, b, pack)

    out = qvalue_head(x, w_packed, b_packed, pack=pack, num_actions=num_actions)
    out = jax.block_until_ready(out)

    # Reference check against plain JAX (same math as torch's F.linear).
    ref = x @ w + b
    assert out.shape == (batch, num_actions)
    assert jnp.allclose(out, ref, atol=1e-5, rtol=1e-5)

    print("KERNEL_OK")
</pallas_src>

<mosaic_0001>
module attributes {stable_mosaic.version = 11 : i64} {
  func.func @_qvalue_head_kernel(%arg0: i32, %arg1: memref<1x512xf32, #tpu.memory_space<vmem>>, %arg2: memref<512x128xf32, #tpu.memory_space<vmem>>, %arg3: memref<1x128xf32, #tpu.memory_space<vmem>>, %arg4: memref<1x128xf32, #tpu.memory_space<vmem>>) attributes {dimension_semantics = [#tpu.dimension_semantics<parallel>], iteration_bounds = array<i64: 1>, scalar_prefetch = 0 : i64, scratch_operands = 0 : i64, tpu.core_type = #tpu.core_type<tc>, window_params = [{transform_indices = @transform_0, window_bounds = array<i64: 1, 512>}, {pipeline_mode = #tpu.pipeline_mode<synchronous>, transform_indices = @transform_1, window_bounds = array<i64: 512, 128>}, {pipeline_mode = #tpu.pipeline_mode<synchronous>, transform_indices = @transform_2, window_bounds = array<i64: 1, 128>}, {transform_indices = @transform_3, window_bounds = array<i64: 1, 128>}]} {
    %c0 = arith.constant 0 : index
    %c0_0 = arith.constant 0 : index
    %0 = vector.load %arg1[%c0, %c0_0] : memref<1x512xf32, #tpu.memory_space<vmem>>, vector<1x512xf32>
    %c0_1 = arith.constant 0 : index
    %c0_2 = arith.constant 0 : index
    %1 = vector.load %arg2[%c0_1, %c0_2] : memref<512x128xf32, #tpu.memory_space<vmem>>, vector<512x128xf32>
    %cst = arith.constant dense<0.000000e+00> : vector<1x128xf32>
    %2 = tpu.matmul %0, %1, %cst {dimension_numbers = #tpu.dot_dimension_numbers<[1], [0], [0], [1], [0, 0, 1, 1], [], []>} : vector<1x512xf32>, vector<512x128xf32>, vector<1x128xf32> -> vector<1x128xf32>
    %c0_3 = arith.constant 0 : index
    %c0_4 = arith.constant 0 : index
    %3 = vector.load %arg3[%c0_3, %c0_4] : memref<1x128xf32, #tpu.memory_space<vmem>>, vector<1x128xf32>
    %4 = arith.addf %2, %3 : vector<1x128xf32>
    %c0_5 = arith.constant 0 : index
    %c0_6 = arith.constant 0 : index
    %5 = vector.load %arg4[%c0_5, %c0_6] : memref<1x128xf32, #tpu.memory_space<vmem>>, vector<1x128xf32>
    tpu.vector_store %arg4[%c0_5, %c0_6], %4 {strides = array<i32>} : memref<1x128xf32, #tpu.memory_space<vmem>>, vector<1x128xf32>,
    return
  }
  func.func @transform_0(%arg0: i32) -> (i32, i32) {
    %c0_i32 = arith.constant 0 : i32
    %c0_i32_0 = arith.constant 0 : i32
    return %arg0, %c0_i32 : i32, i32
  }
  func.func @transform_1(%arg0: i32) -> (i32, i32) {
    %c0_i32 = arith.constant 0 : i32
    %c0_i32_0 = arith.constant 0 : i32
    %c0_i32_1 = arith.constant 0 : i32
    return %c0_i32, %c0_i32_0 : i32, i32
  }
  func.func @transform_2(%arg0: i32) -> (i32, i32) {
    %c0_i32 = arith.constant 0 : i32
    %c0_i32_0 = arith.constant 0 : i32
    %c0_i32_1 = arith.constant 0 : i32
    return %c0_i32, %c0_i32_0 : i32, i32
  }
  func.func @transform_3(%arg0: i32) -> (i32, i32) {
    %c0_i32 = arith.constant 0 : i32
    %c0_i32_0 = arith.constant 0 : i32
    return %arg0, %c0_i32 : i32, i32
  }
}

</mosaic_0001>

<bundles_post_ra>
// kernel: tpu_custom_call.1
= control target key start
LH: loop header
LB: loop body
LE: loop exit
PB: predicated region body
PF: predicated region fallthrough
CT: control target
= control target key end

     0   :  { %8 = vsyncpa [#allocation3], 0  ;;  %s573_s0 = inlined_call_operand.hbm [shape: f32[1,512], index: 0, kind: input, shape index: {}]   ;;  %s574_s1 = inlined_call_operand.hbm [shape: f32[512,128], index: 1, kind: input, shape index: {}]   ;;  %s575_s2 = inlined_call_operand.vmem [shape: f32[1,128], index: 2, kind: input, shape index: {}]   ;;  %s576_s3 = inlined_call_operand.hbm [shape: f32[1,128], index: 3, kind: output, shape index: {}]  }
   0x1   :  { %9 = vsyncpa [#allocation6], 0 }
   0x2   :  { %10 = vsyncpa [#allocation4], 0  ;;  %s496_s12 = smov [#allocation2]   ;;  %s497_s14 = smov [#allocation5]  }
   0x3   :  { %s17_s13 = sshll.u32 %s496_s12, 4  ;;  %s26_s15 = sshll.u32 %s497_s14, 4  ;;  %s18_s13 = int_to_ptr.vmem [resolvable:$true] %s17_s13  ;;  %s521_s15 = int_to_ptr.vmem [resolvable:$true] %s26_s15 }
   0x4   :  { %s424_s18 = scalar_lea.hbm %s573_s0, 64 }
   0x5   :  { %p425_p0 = scmp.ne.s32.totalorder %s573_s0, %s424_s18  ;;  %p428_p1 = scmp.lt.u32.totalorder %s424_s18, %s573_s0 }
   0x7   :  { %p430_p2 = pnand %p428_p1, %p425_p0 }
   0x9   :  { %433 = shalt.err (!%p430_p2)
}
   0xa   :  { %s434_s23 = scalar_lea.vmem %s18_s13, 64  ;;  %p439_p4 = scmp.lt.s32.totalorder %s18_s13, %s18_s13 }
   0xb   :  { %p435_p3 = scmp.ne.s32.totalorder %s18_s13, %s434_s23  ;;  %p440_p5 = scmp.lt.s32.totalorder %s434_s23, %s434_s23 }
   0xd   :  { %p441_p6 = por %p440_p5, %p439_p4 }
   0xf   :  { %p442_p7 = pnand %p441_p6, %p435_p3 }
  0x11   :  { %445 = shalt.err (!%p442_p7)
}
  0x12   :  { %20 = dma.hbm_to_vmem [thread:$0]  %s573_s0, 64, %s18_s13, [#allocation3]  }
  0x13   :  { %s446_s28 = scalar_lea.hbm %s574_s1, 8192 }
  0x14   :  { %p447_p8 = scmp.ne.s32.totalorder %s574_s1, %s446_s28  ;;  %p450_p9 = scmp.lt.u32.totalorder %s446_s28, %s574_s1 }
  0x16   :  { %p452_p10 = pnand %p450_p9, %p447_p8 }
  0x18   :  { %455 = shalt.err (!%p452_p10)
}
  0x19   :  { %s456_s6 = scalar_lea.vmem %s521_s15, 8192  ;;  %p461_p12 = scmp.lt.s32.totalorder %s521_s15, %s521_s15 }
  0x1a   :  { %p457_p11 = scmp.ne.s32.totalorder %s521_s15, %s456_s6  ;;  %p462_p13 = scmp.lt.s32.totalorder %s456_s6, %s456_s6 }
  0x1c   :  { %p463_p0 = por %p462_p13, %p461_p12 }
  0x1e   :  { %p464_p1 = pnand %p463_p0, %p457_p11 }
  0x20   :  { %467 = shalt.err (!%p464_p1)
}
  0x21   :  { %s498_s0 = smov 128   ;;  %s499_s7 = smov 8  }
  0x22   :  { %32 = dma.hbm_to_vmem [thread:$0]  %s574_s1, 8192, %s521_s15, [#allocation6], %s498_s0, %s498_s0, %s499_s7  }
  0x23   :  { %490 = dma.done.wait [#allocation3], 64  }
  0x24   :  { %491 = vsyncadd [#allocation3], 4294967232 }
  0x25   :  { %492 = dma.done.wait [#allocation6], 8192  }
  0x26   :  { %493 = vsyncadd [#allocation6], 4294959104  ;;  %v58_v0 = vld [vmem:[#allocation5 + $0x80] sm:$0xff]  ;;  %v59_v1 = vld [vmem:[#allocation5 + $0x88] sm:$0xff]  ;;  %v108_v47 = vlaneseq  ;;  %s500_s11 = smov [#allocation7]  }
  0x27   :  { %v42_v2 = vld [vmem:[#allocation5] sm:$0xff]  ;;  %v355_v3 = vpack.c.bf16 %v59_v1, %v58_v0  ;;  %v43_v4 = vld [vmem:[#allocation5 + $0x8] sm:$0xff]  ;;  %v60_v11 = vld [vmem:[#allocation5 + $0x90] sm:$0xff]  ;;  %s275_s12 = sshll.u32 %s500_s11, 4  ;;  %s276_s12 = int_to_ptr.vmem [resolvable:$true] %s275_s12 }
  0x28   :  { %v90_v5 = vld [vmem:[#allocation5 + $0x180] sm:$0xff]  ;;  %v91_v6 = vld [vmem:[#allocation5 + $0x188] sm:$0xff]  ;;  %v357_v7 = vpack.c.bf16 %v43_v4, %v42_v2  ;;  %v61_v13 = vld [vmem:[#allocation5 + $0x98] sm:$0xff]  ;;  %v552_v61 = vshrl.u32 %v108_v47, 7  ;;  %s468_s13 = scalar_lea.vmem %s276_s12, 16  ;;  %s472_s14 = scalar_lea.vmem %s276_s12, 32 }
  0x29   :  { %v387_v8 = vpack.c.bf16 %v91_v6, %v90_v5  ;;  %v74_v9 = vld [vmem:[#allocation5 + $0x100] sm:$0xff]  ;;  %v75_v10 = vld [vmem:[#allocation5 + $0x108] sm:$0xff]  ;;  %356 = vmatprep.subr.bf16.mxu0 %v355_v3  ;;  %v44_v14 = vld [vmem:[#allocation5 + $0x10] sm:$0xff]  ;;  %v359_v16 = vpack.c.bf16 %v61_v13, %v60_v11  ;;  %p469_p2 = scmp.ne.s32.totalorder %s276_s12, %s468_s13  ;;  %p473_p3 = scmp.lt.s32.totalorder %s276_s12, %s276_s12 }
  0x2a   :  { %v389_v12 = vpack.c.bf16 %v75_v10, %v74_v9  ;;  %v45_v15 = vld [vmem:[#allocation5 + $0x18] sm:$0xff]  ;;  %358 = vmatpush3.bf16.msra.mxu0 %v357_v7  ;;  %v92_v18 = vld [vmem:[#allocation5 + $0x190] sm:$0xff]  ;;  %v62_v23 = vld [vmem:[#allocation5 + $0xa0] sm:$0xff]  ;;  %v114_v10 = vsub.s32 1, %v552_v61  ;;  %v122_v11 = vsub.s32 3, %v552_v61  ;;  %p474_p4 = scmp.lt.s32.totalorder %s472_s14, %s468_s13 }
  0x2b   :  { %388 = vmatprep.subr.bf16.mxu1 %v387_v8  ;;  %v361_v17 = vpack.c.bf16 %v45_v15, %v44_v14  ;;  %v93_v19 = vld [vmem:[#allocation5 + $0x198] sm:$0xff]  ;;  %v76_v20 = vld [vmem:[#allocation5 + $0x110] sm:$0xff]  ;;  %v63_v24 = vld [vmem:[#allocation5 + $0xa8] sm:$0xff]  ;;  %360 = vmatprep.subr.bf16.mxu0 %v359_v16 }
  0x2c   :  { %390 = vmatpush3.bf16.msra.mxu1 %v389_v12  ;;  %v391_v21 = vpack.c.bf16 %v93_v19, %v92_v18  ;;  %v77_v22 = vld [vmem:[#allocation5 + $0x118] sm:$0xff]  ;;  %v363_v26 = vpack.c.bf16 %v63_v24, %v62_v23  ;;  %v46_v27 = vld [vmem:[#allocation5 + $0x20] sm:$0xff]  ;;  %v47_v28 = vld [vmem:[#allocation5 + $0x28] sm:$0xff]  ;;  %p475_p5 = por %p474_p4, %p473_p3 }
  0x2d   :  { %v393_v25 = vpack.c.bf16 %v77_v22, %v76_v20  ;;  %v94_v29 = vld [vmem:[#allocation5 + $0x1a0] sm:$0xff]  ;;  %v95_v30 = vld [vmem:[#allocation5 + $0x1a8] sm:$0xff]  ;;  %v365_v33 = vpack.c.bf16 %v47_v28, %v46_v27  ;;  %v64_v35 = vld [vmem:[#allocation5 + $0xb0] sm:$0xff] }
  0x2e   :  { %392 = vmatprep.subr.bf16.mxu1 %v391_v21  ;;  %v78_v31 = vld [vmem:[#allocation5 + $0x120] sm:$0xff]  ;;  %v79_v32 = vld [vmem:[#allocation5 + $0x128] sm:$0xff]  ;;  %362 = vmatpush3.bf16.msra.mxu0 %v361_v17  ;;  %v395_v34 = vpack.c.bf16 %v95_v30, %v94_v29  ;;  %v65_v36 = vld [vmem:[#allocation5 + $0xb8] sm:$0xff]  ;;  %p476_p6 = pnand %p475_p5, %p469_p2 }
  0x2f   :  { %v48_v37 = vld [vmem:[#allocation5 + $0x30] sm:$0xff]  ;;  %364 = vmatprep.subr.bf16.mxu0 %v363_v26  ;;  %v397_v38 = vpack.c.bf16 %v79_v32, %v78_v31  ;;  %v367_v39 = vpack.c.bf16 %v65_v36, %v64_v35  ;;  %v49_v40 = vld [vmem:[#allocation5 + $0x38] sm:$0xff]  ;;  %v66_v46 = vld [vmem:[#allocation5 + $0xc0] sm:$0xff] }
  0x30   :  { %394 = vmatpush3.bf16.msra.mxu1 %v393_v25  ;;  %v96_v41 = vld [vmem:[#allocation5 + $0x1b0] sm:$0xff]  ;;  %v97_v42 = vld [vmem:[#allocation5 + $0x1b8] sm:$0xff]  ;;  %v67_v48 = vld [vmem:[#allocation5 + $0xc8] sm:$0xff]  ;;  %v369_v49 = vpack.c.bf16 %v49_v40, %v48_v37  ;;  %v110_v37 = vsub.s32 0, %v552_v61 }
  0x31   :  { %396 = vmatprep.subr.bf16.mxu1 %v395_v34  ;;  %v399_v43 = vpack.c.bf16 %v97_v42, %v96_v41  ;;  %v80_v44 = vld [vmem:[#allocation5 + $0x130] sm:$0xff]  ;;  %v81_v45 = vld [vmem:[#allocation5 + $0x138] sm:$0xff]  ;;  %v98_v50 = vld [vmem:[#allocation5 + $0x1c0] sm:$0xff]  ;;  %v371_v53 = vpack.c.bf16 %v67_v48, %v66_v46 }
  0x32   :  { %366 = vmatpush3.bf16.msra.mxu0 %v365_v33  ;;  %v99_v51 = vld [vmem:[#allocation5 + $0x1c8] sm:$0xff]  ;;  %v401_v52 = vpack.c.bf16 %v81_v45, %v80_v44  ;;  %v50_v54 = vld [vmem:[#allocation5 + $0x40] sm:$0xff]  ;;  %v68_v59 = vld [vmem:[#allocation5 + $0xd0] sm:$0xff] }
  0x33   :  { %368 = vmatprep.subr.bf16.mxu0 %v367_v39  ;;  %v51_v55 = vld [vmem:[#allocation5 + $0x48] sm:$0xff]  ;;  %v82_v56 = vld [vmem:[#allocation5 + $0x140] sm:$0xff]  ;;  %v403_v57 = vpack.c.bf16 %v99_v51, %v98_v50  ;;  %v69_v60 = vld [vmem:[#allocation5 + $0xd8] sm:$0xff]  ;;  %v118_v39 = vsub.s32 2, %v552_v61 }
  0x34   :  { %398 = vmatpush3.bf16.msra.mxu1 %v397_v38  ;;  %v83_v58 = vld [vmem:[#allocation5 + $0x148] sm:$0xff]  ;;  %v100_v62 = vld [vmem:[#allocation5 + $0x1d0] sm:$0xff]  ;;  %v101_v63 = vld [vmem:[#allocation5 + $0x1d8] sm:$0xff]  ;;  %v373_v0 = vpack.c.bf16 %v51_v55, %v50_v54  ;;  %v375_v2 = vpack.c.bf16 %v69_v60, %v68_v59 }
  0x35   :  { %400 = vmatprep.subr.bf16.mxu1 %v399_v43  ;;  %v405_v1 = vpack.c.bf16 %v83_v58, %v82_v56  ;;  %v52_v3 = vld [vmem:[#allocation5 + $0x50] sm:$0xff]  ;;  %v53_v4 = vld [vmem:[#allocation5 + $0x58] sm:$0xff]  ;;  %v407_v6 = vpack.c.bf16 %v101_v63, %v100_v62  ;;  %v70_v8 = vld [vmem:[#allocation5 + $0xe0] sm:$0xff] }
  0x36   :  { %370 = vmatpush3.bf16.msra.mxu0 %v369_v49  ;;  %v84_v5 = vld [vmem:[#allocation5 + $0x150] sm:$0xff]  ;;  %v85_v7 = vld [vmem:[#allocation5 + $0x158] sm:$0xff]  ;;  %v71_v9 = vld [vmem:[#allocation5 + $0xe8] sm:$0xff]  ;;  %v377_v14 = vpack.c.bf16 %v53_v4, %v52_v3 }
  0x37   :  { %372 = vmatprep.subr.bf16.mxu0 %v371_v53  ;;  %v102_v12 = vld [vmem:[#allocation5 + $0x1e0] sm:$0xff]  ;;  %v103_v13 = vld [vmem:[#allocation5 + $0x1e8] sm:$0xff]  ;;  %v409_v16 = vpack.c.bf16 %v85_v7, %v84_v5  ;;  %v379_v17 = vpack.c.bf16 %v71_v9, %v70_v8  ;;  %v41_v20 = vld [vmem:[#allocation2] sm:$0xf] }
  0x38   :  { %402 = vmatpush3.bf16.msra.mxu1 %v401_v52  ;;  %v54_v15 = vld [vmem:[#allocation5 + $0x60] sm:$0xff]  ;;  %v55_v18 = vld [vmem:[#allocation5 + $0x68] sm:$0xff]  ;;  %v411_v21 = vpack.c.bf16 %v103_v13, %v102_v12  ;;  %v72_v23 = vld [vmem:[#allocation5 + $0xf0] sm:$0xff]  ;;  %v115_v25 = vrot.slane %v41_v20, %v114_v10  ;;  %v123_v26 = vrot.slane %v41_v20, %v122_v11  ;;  %v111_v41 = vrot.slane %v41_v20, %v110_v37 }
  0x39   :  { %404 = vmatprep.subr.bf16.mxu1 %v403_v57  ;;  %v86_v19 = vld [vmem:[#allocation5 + $0x160] sm:$0xff]  ;;  %v87_v22 = vld [vmem:[#allocation5 + $0x168] sm:$0xff]  ;;  %v73_v24 = vld [vmem:[#allocation5 + $0xf8] sm:$0xff]  ;;  %v381_v29 = vpack.c.bf16 %v55_v18, %v54_v15  ;;  %v119_v42 = vrot.slane %v41_v20, %v118_v39 }
  0x3a   :  { %374 = vmatpush3.bf16.msra.mxu0 %v373_v0  ;;  %v104_v27 = vld [vmem:[#allocation5 + $0x1f0] sm:$0xff]  ;;  %v105_v28 = vld [vmem:[#allocation5 + $0x1f8] sm:$0xff]  ;;  %192 = vmatprep.mubr.f32.mxu0 %v115_v25  ;;  %v413_v30 = vpack.c.bf16 %v87_v22, %v86_v19  ;;  %v383_v31 = vpack.c.bf16 %v73_v24, %v72_v23 }
  0x3b   :  { %376 = vmatprep.subr.bf16.mxu0 %v375_v2  ;;  %v56_v32 = vld [vmem:[#allocation5 + $0x70] sm:$0xff]  ;;  %v57_v33 = vld [vmem:[#allocation5 + $0x78] sm:$0xff]  ;;  %v415_v34 = vpack.c.bf16 %v105_v28, %v104_v27  ;;  %262 = vmatprep.mubr.f32.mxu1 %v123_v26 }
  0x3c   :  { %406 = vmatpush3.bf16.msra.mxu1 %v405_v1  ;;  %v88_v35 = vld [vmem:[#allocation5 + $0x170] sm:$0xff]  ;;  %v89_v36 = vld [vmem:[#allocation5 + $0x178] sm:$0xff]  ;;  %v385_v38 = vpack.c.bf16 %v57_v33, %v56_v32 }
  0x3d   :  { %408 = vmatprep.subr.bf16.mxu1 %v407_v6  ;;  %v417_v40 = vpack.c.bf16 %v89_v36, %v88_v35  ;;  %v106_v44 = vld [vmem:[%s575_s2] sm:$0x1] }
  0x3e   :  { %378 = vmatpush3.bf16.msra.mxu0 %v377_v14 }
  0x3f   :  { %380 = vmatprep.subr.bf16.mxu0 %v379_v17 }
  0x40   :  { %410 = vmatpush3.bf16.msra.mxu1 %v409_v16 }
  0x41   :  { %412 = vmatprep.subr.bf16.mxu1 %v411_v21 }
  0x42   :  { %382 = vmatpush3.bf16.msra.mxu0 %v381_v29 }
  0x43   :  { %384 = vmatprep.subr.bf16.mxu0 %v383_v31 }
  0x44   :  { %414 = vmatpush3.bf16.msra.mxu1 %v413_v30 }
  0x45   :  { %416 = vmatprep.subr.bf16.mxu1 %v415_v34 }
  0x46   :  { %386 = vmatpush3.bf16.msra.mxu0 %v385_v38 }
  0x48   :  { %418 = vmatpush3.bf16.msra.mxu1 %v417_v40 }
  0x49   :  { %193 = vmatmul.mubr.f32.vlgmr.msra.gmra.mrb[0].mxu0 %v111_v41 }
  0x4b   :  { %263 = vmatmul.mubr.f32.vlgmr.msra.gmra.mrb[0].mxu1 %v119_v42 }
 0x11c   :  { %v317_v43 = vpop.f32.mrb[0].mxu0 }
 0x11d   :  { %v318_v45 = vpop.f32.mrb[1].mxu0 }
 0x11e   :  { %v352_v46 = vpop.f32.mrb[0].mxu1  ;;  %v319_v47 = vadd.f32 %v318_v45, %v317_v43 }
 0x11f   :  { %v353_v48 = vpop.f32.mrb[1].mxu1 }
 0x120   :  { %v354_v49 = vadd.f32 %v353_v48, %v352_v46  ;;  %v195_v50 = vadd.f32 %v319_v47, %v106_v44 }
 0x122   :  { %v265_v51 = vadd.f32 %v354_v49, %v195_v50 }
 0x124   :  { %268 = vst [vmem:[#allocation7] sm:$0x1] %v265_v51 }
 0x125   :  { %479 = shalt.err (!%p476_p6)
}
 0x126   :  { %s480_s16 = scalar_lea.hbm %s576_s3, 16 }
 0x127   :  { %p481_p7 = scmp.ne.s32.totalorder %s576_s3, %s480_s16  ;;  %p484_p8 = scmp.lt.u32.totalorder %s480_s16, %s576_s3 }
 0x129   :  { %p486_p9 = pnand %p484_p8, %p481_p7 }
 0x12b   :  { %489 = shalt.err (!%p486_p9)
}
 0x12c   :  { %278 = dma.vmem_to_hbm [thread:$0]  %s276_s12, 16, %s576_s3, [#allocation4]  }
 0x12d   :  { %494 = dma.done.wait [#allocation4], 16  }
 0x12e   :  { %495 = vsyncadd [#allocation4], 4294967280 }
 0x12f   :  { %282 = vsyncpa [#allocation3], 1 }
 0x130   :  { %283 = vsyncpa [#allocation6], 1 }
 0x131   :  { %284 = vsyncpa [#allocation4], 1 }

</bundles_post_ra>
